<compile_context>
chip_gen: v5e
topology: v5e:2x2
jax: 0.10.0
libtpu: 0.0.40
codegen_flags: <defaults>
</compile_context>

<pallas_src>
import jax
import jax.numpy as jnp
from jax import lax
from jax.experimental import pallas as pl
from jax.experimental.pallas import tpu as pltpu


def _round_up(v, m):
    return (v + m - 1) // m * m


def _vmem_budget_bytes():
    """Generation-aware VMEM budget: ~75% of physical (v7x 64 MiB vs 128 MiB)."""
    try:
        info = pltpu.get_tpu_info()
        cap = int(getattr(info, "vmem_capacity_bytes", 0)) or (64 << 20)
    except Exception:  # API/hardware query unavailable -> conservative default
        cap = 64 << 20
    return (cap * 3) // 4


def _pick_pixel_tile(hw, bytes_per_pixel, budget_bytes, cap):
    """Largest multiple-of-128 pixel tile that fits the VMEM budget (<= cap).

    The grid uses pl.cdiv(hw, tp), so hw need NOT divide evenly: Pallas masks
    the partial last block.  (Fixes the old fallback that returned tp = hw for
    non-multiple-of-128 resolutions and OOM'd VMEM.)
    """
    tp = budget_bytes // max(bytes_per_pixel, 1)
    tp = min(tp, cap, _round_up(hw, 128))
    tp = max(128, (tp // 128) * 128)
    return int(tp)


def _head_kernel(x_ref, w_ref, num_ref, t_ref):
    """Fused cosine head + temperature 1x1 conv for one (C, TP) pixel tile.

    x_ref   : (C, TP)   raw penultimate features, f32 (channels on sublanes)
    w_ref   : (8+K, C)  bf16: row 0 = temperature conv, rows 1..7 = zero pad,
                        rows 8..8+K-1 = L2-normalized head weight
    num_ref : (K, TP)   cosine logit numerators
    t_ref   : (1, TP)   pre-BatchNorm temperature activation
    """
    k = num_ref.shape[0]
    c = x_ref.shape[0]

    # Single cast of x to bf16; every further full-tile pass is bf16.
    xb = x_ref[...].astype(jnp.bfloat16)                            # (C, TP)

    # One MXU pass gives head numerators AND the temperature conv.
    raw = jnp.dot(w_ref[...], xb, preferred_element_type=jnp.float32)  # (8+K, TP)

    # ||x||^2 on the (otherwise idle) MXU instead of an f32 VALU/XLU reduce.
    sq = jnp.dot(jnp.ones((1, c), jnp.bfloat16), xb * xb,
                 preferred_element_type=jnp.float32)                # (1, TP)
    inv_norm = pl.reciprocal(jnp.sqrt(sq) + 1e-4, approx=True)      # (1, TP)

    # Both slices start at sublane-group (8-row) boundaries.
    num_ref[...] = raw[8:8 + k, :] * inv_norm                       # (K, TP)
    t_ref[...] = raw[0:1, :]                                        # (1, TP)


def _bn_apply_kernel(num_ref, t_ref, p_ref, logits_ref, temp_ref):
    """BatchNorm(1) with global batch stats + sigmoid temperature + scaling.

    p_ref (SMEM, (4,) f32): [mean, inv_std, gamma, beta].
    """
    mean = p_ref[0]
    inv_std = p_ref[1]
    gamma = p_ref[2]
    beta = p_ref[3]

    t = t_ref[...]                                                  # (1, TP)
    t_bn = (t - mean) * (inv_std * gamma) + beta
    temperature = jax.nn.sigmoid(t_bn) + 1e-12                      # (1, TP)

    # Exact reciprocal: temperature can be ~1e-12, where an approx EUP recip's
    # relative error turns into huge absolute logit errors.  (1, TP) is cheap.
    inv_temp = 1.0 / temperature

    logits_ref[...] = num_ref[...] * inv_temp                       # (K, TP)
    temp_ref[...] = temperature


@jax.jit
def learned_temperature_semseg_forward(x_nchw, w_head, w_temp, bn_gamma, bn_beta):
    """x_nchw: (N, C, H, W) penultimate features.

    Returns (logits, logit_numerators, temperature) in NCHW, matching the
    PyTorch module's forward (training-mode BatchNorm batch statistics).
    """
    N, C, H, W = x_nchw.shape
    K = w_head.shape[0]
    HW = H * W
    x = x_nchw.reshape(N, C, HW)          # free reshape, stays channel-major

    # Tiny weight prep in XLA: L2-normalize head rows, put the temperature row
    # in its own 8-row sublane group, pre-cast ONCE to bf16 (no per-step cast).
    whn = w_head / (jnp.sqrt(jnp.sum(w_head * w_head, axis=1, keepdims=True)) + 1e-4)
    w_aug = jnp.concatenate(
        [w_temp.astype(jnp.float32),
         jnp.zeros((7, C), jnp.float32),
         whn.astype(jnp.float32)], axis=0).astype(jnp.bfloat16)     # (8+K, C)
    R = 8 + K

    budget = int(_vmem_budget_bytes())

    # ---- Pass 1: fused matmul -> numerators + pre-BN temperature -----------
    # Per-pixel VMEM: double-buffered f32 in/out blocks + bf16/f32 temporaries.
    bpp1 = 8 * (C + K + 1) + 4 * C + 4 * (R + 4)
    TP1 = _pick_pixel_tile(HW, bpp1, budget, cap=8192)
    grid1 = (N, pl.cdiv(HW, TP1))
    num, t = pl.pallas_call(
        _head_kernel,
        out_shape=(jax.ShapeDtypeStruct((N, K, HW), jnp.float32),
                   jax.ShapeDtypeStruct((N, 1, HW), jnp.float32)),
        grid=grid1,
        in_specs=[
            pl.BlockSpec((None, C, TP1), lambda n, p: (n, 0, p)),
            pl.BlockSpec((R, C), lambda n, p: (0, 0)),
        ],
        out_specs=(
            pl.BlockSpec((None, K, TP1), lambda n, p: (n, 0, p)),
            pl.BlockSpec((None, 1, TP1), lambda n, p: (n, 0, p)),
        ),
        compiler_params=pltpu.CompilerParams(
            dimension_semantics=("parallel", "parallel"),
            vmem_limit_bytes=budget),
    )(x, w_aug)

    # ---- BatchNorm2d(1) batch statistics (global over all N*H*W pixels) ----
    # t is tiny (N*HW floats); reduce in plain XLA, ship scalars via SMEM.
    # TODO(synk): emit per-tile (sum, sum_sq) partials from pass 1 instead of
    # re-reading t, and update BN running mean/var buffers (forward-only here).
    mean = jnp.mean(t)
    var = jnp.mean(jnp.square(t - mean))            # biased var, as in BN
    inv_std = lax.rsqrt(var + 1e-5)
    bn_params = jnp.stack([mean, inv_std,
                           bn_gamma[0].astype(jnp.float32),
                           bn_beta[0].astype(jnp.float32)])

    # ---- Pass 2: sigmoid temperature + scale --------------------------------
    # Per-pixel traffic here is only ~(K+1) words each way, so use a much
    # larger tile than pass 1 (otherwise launch-overhead dominated).
    bpp2 = 16 * (K + 1) + 8 * (K + 2)
    TP2 = _pick_pixel_tile(HW, bpp2, budget, cap=16384)
    grid2 = (N, pl.cdiv(HW, TP2))
    logits, temperature = pl.pallas_call(
        _bn_apply_kernel,
        out_shape=(jax.ShapeDtypeStruct((N, K, HW), jnp.float32),
                   jax.ShapeDtypeStruct((N, 1, HW), jnp.float32)),
        grid=grid2,
        in_specs=[
            pl.BlockSpec((None, K, TP2), lambda n, p: (n, 0, p)),
            pl.BlockSpec((None, 1, TP2), lambda n, p: (n, 0, p)),
            pl.BlockSpec(memory_space=pltpu.MemorySpace.SMEM),
        ],
        out_specs=(
            pl.BlockSpec((None, K, TP2), lambda n, p: (n, 0, p)),
            pl.BlockSpec((None, 1, TP2), lambda n, p: (n, 0, p)),
        ),
        input_output_aliases={1: 1},   # reuse t's HBM buffer for temperature
        compiler_params=pltpu.CompilerParams(
            dimension_semantics=("parallel", "parallel"),
            vmem_limit_bytes=budget),
    )(num, t, bn_params)

    return (logits.reshape(N, K, H, W),
            num.reshape(N, K, H, W),
            temperature.reshape(N, 1, H, W))


def _reference_forward(x_nchw, w_head, w_temp, bn_gamma, bn_beta):
    """Pure-JAX mirror of the PyTorch forward (training-mode BN), f32 HIGHEST."""
    xn = x_nchw / (jnp.linalg.norm(x_nchw, axis=1, keepdims=True) + 1e-4)
    whn = w_head / (jnp.linalg.norm(w_head, axis=1, keepdims=True) + 1e-4)
    num = jnp.einsum('nchw,kc->nkhw', xn, whn, precision=lax.Precision.HIGHEST)
    t = jnp.einsum('nchw,c->nhw', x_nchw, w_temp[0],
                   precision=lax.Precision.HIGHEST)[:, None]
    mean = jnp.mean(t)
    var = jnp.mean((t - mean) ** 2)
    t_bn = (t - mean) / jnp.sqrt(var + 1e-5) * bn_gamma[0] + bn_beta[0]
    temp = jax.nn.sigmoid(t_bn) + 1e-12
    return num / temp, num, temp


if __name__ == "__main__":
    N, C, H, W = 2, 256, 16, 16      # in_features = 256 (module default)
    K = 19                           # num_classes

    key = jax.random.PRNGKey(0)
    kx, kh, kt = jax.random.split(key, 3)

    # Penultimate representations (underlying model treated as identity).
    x = jax.random.normal(kx, (N, C, H, W), dtype=jnp.float32)

    # Cosine head: Conv2d(C, K, 1, bias=False), kaiming_normal_ (relu) -> (K, C).
    w_head = jax.random.normal(kh, (K, C), dtype=jnp.float32) * jnp.sqrt(2.0 / C)

    # Temperature conv: Conv2d(C, 1, 1, bias=False) default init -> (1, C).
    bound = 1.0 / jnp.sqrt(C)
    w_temp = jax.random.uniform(kt, (1, C), dtype=jnp.float32,
                                minval=-bound, maxval=bound)

    # BatchNorm2d(1) affine params (default init).
    bn_gamma = jnp.ones((1,), dtype=jnp.float32)
    bn_beta = jnp.zeros((1,), dtype=jnp.float32)

    outs = learned_temperature_semseg_forward(x, w_head, w_temp, bn_gamma, bn_beta)
    jax.block_until_ready(outs)
    logits, numerators, temperature = outs

    # Sanity check against an accurate pure-JAX reference.  Tolerances account
    # for bf16 MXU operands (dot + norm) and the approx EUP norm reciprocal.
    r_logits, r_num, r_temp = _reference_forward(x, w_head, w_temp,
                                                 bn_gamma, bn_beta)
    assert logits.shape == (N, K, H, W)
    assert numerators.shape == (N, K, H, W)
    assert temperature.shape == (N, 1, H, W)
    assert jnp.allclose(numerators, r_num, rtol=1e-2, atol=8e-3)
    assert jnp.allclose(temperature, r_temp, rtol=1e-2, atol=5e-3)
    assert jnp.allclose(logits, r_logits, rtol=1.5e-2, atol=3e-2)

    print("KERNEL_OK")
</pallas_src>

<mosaic_0001>
module attributes {stable_mosaic.version = 11 : i64} {
  func.func @_head_kernel(%arg0: i32, %arg1: i32, %arg2: memref<1x256x256xf32, #tpu.memory_space<vmem>>, %arg3: memref<27x256xbf16, #tpu.memory_space<vmem>>, %arg4: memref<1x19x256xf32, #tpu.memory_space<vmem>>, %arg5: memref<1x1x256xf32, #tpu.memory_space<vmem>>) attributes {dimension_semantics = [#tpu.dimension_semantics<parallel>, #tpu.dimension_semantics<parallel>], iteration_bounds = array<i64: 2, 1>, scalar_prefetch = 0 : i64, scratch_operands = 0 : i64, tpu.core_type = #tpu.core_type<tc>, window_params = [{transform_indices = @transform_0, window_bounds = array<i64: 1, 256, 256>}, {pipeline_mode = #tpu.pipeline_mode<synchronous>, transform_indices = @transform_1, window_bounds = array<i64: 27, 256>}, {transform_indices = @transform_2, window_bounds = array<i64: 1, 19, 256>}, {transform_indices = @transform_3, window_bounds = array<i64: 1, 1, 256>}]} {
    %c0 = arith.constant 0 : index
    %c0_0 = arith.constant 0 : index
    %c0_1 = arith.constant 0 : index
    %0 = vector.load %arg2[%c0, %c0_0, %c0_1] : memref<1x256x256xf32, #tpu.memory_space<vmem>>, vector<1x256x256xf32>
    %1 = vector.shape_cast %0 : vector<1x256x256xf32> to vector<256x256xf32>
    %2 = arith.truncf %1 : vector<256x256xf32> to vector<256x256xbf16>
    %c0_2 = arith.constant 0 : index
    %c0_3 = arith.constant 0 : index
    %3 = vector.load %arg3[%c0_2, %c0_3] : memref<27x256xbf16, #tpu.memory_space<vmem>>, vector<27x256xbf16>
    %cst = arith.constant dense<0.000000e+00> : vector<27x256xf32>
    %4 = tpu.matmul %3, %2, %cst {dimension_numbers = #tpu.dot_dimension_numbers<[1], [0], [0], [1], [0, 0, 1, 1], [], []>} : vector<27x256xbf16>, vector<256x256xbf16>, vector<27x256xf32> -> vector<27x256xf32>
    %cst_4 = arith.constant 1.000000e+00 : bf16
    %5 = vector.broadcast %cst_4 : bf16 to vector<1x256xbf16>
    %6 = arith.mulf %2, %2 : vector<256x256xbf16>
    %cst_5 = arith.constant dense<0.000000e+00> : vector<1x256xf32>
    %7 = tpu.matmul %5, %6, %cst_5 {dimension_numbers = #tpu.dot_dimension_numbers<[1], [0], [0], [1], [0, 0, 1, 1], [], []>} : vector<1x256xbf16>, vector<256x256xbf16>, vector<1x256xf32> -> vector<1x256xf32>
    %8 = math.sqrt %7 : vector<1x256xf32>
    %cst_6 = arith.constant 9.99999974E-5 : f32
    %9 = vector.broadcast %cst_6 : f32 to vector<1x256xf32>
    %10 = arith.addf %8, %9 : vector<1x256xf32>
    %11 = tpu.reciprocal %10 {approx = true} : vector<1x256xf32> -> vector<1x256xf32>
    %12 = vector.extract_strided_slice %4 {offsets = [8, 0], sizes = [19, 256], strides = [1, 1]} : vector<27x256xf32> to vector<19x256xf32>
    %13 = vector.broadcast %11 : vector<1x256xf32> to vector<19x256xf32>
    %14 = arith.mulf %12, %13 : vector<19x256xf32>
    %c0_7 = arith.constant 0 : index
    %c0_8 = arith.constant 0 : index
    %c0_9 = arith.constant 0 : index
    %15 = vector.load %arg4[%c0_7, %c0_8, %c0_9] : memref<1x19x256xf32, #tpu.memory_space<vmem>>, vector<1x19x256xf32>
    %16 = vector.shape_cast %15 : vector<1x19x256xf32> to vector<19x256xf32>
    %17 = vector.shape_cast %14 : vector<19x256xf32> to vector<1x19x256xf32>
    tpu.vector_store %arg4[%c0_7, %c0_8, %c0_9], %17 {strides = array<i32>} : memref<1x19x256xf32, #tpu.memory_space<vmem>>, vector<1x19x256xf32>,
    %18 = vector.extract_strided_slice %4 {offsets = [0, 0], sizes = [1, 256], strides = [1, 1]} : vector<27x256xf32> to vector<1x256xf32>
    %c0_10 = arith.constant 0 : index
    %c0_11 = arith.constant 0 : index
    %c0_12 = arith.constant 0 : index
    %19 = vector.load %arg5[%c0_10, %c0_11, %c0_12] : memref<1x1x256xf32, #tpu.memory_space<vmem>>, vector<1x1x256xf32>
    %20 = vector.shape_cast %19 : vector<1x1x256xf32> to vector<1x256xf32>
    %21 = vector.shape_cast %18 : vector<1x256xf32> to vector<1x1x256xf32>
    tpu.vector_store %arg5[%c0_10, %c0_11, %c0_12], %21 {strides = array<i32>} : memref<1x1x256xf32, #tpu.memory_space<vmem>>, vector<1x1x256xf32>,
    return
  }
  func.func @transform_0(%arg0: i32, %arg1: i32) -> (i32, i32, i32) {
    %c0_i32 = arith.constant 0 : i32
    %c0_i32_0 = arith.constant 0 : i32
    return %arg0, %c0_i32, %arg1 : i32, i32, i32
  }
  func.func @transform_1(%arg0: i32, %arg1: i32) -> (i32, i32) {
    %c0_i32 = arith.constant 0 : i32
    %c0_i32_0 = arith.constant 0 : i32
    %c0_i32_1 = arith.constant 0 : i32
    return %c0_i32, %c0_i32_0 : i32, i32
  }
  func.func @transform_2(%arg0: i32, %arg1: i32) -> (i32, i32, i32) {
    %c0_i32 = arith.constant 0 : i32
    %c0_i32_0 = arith.constant 0 : i32
    return %arg0, %c0_i32, %arg1 : i32, i32, i32
  }
  func.func @transform_3(%arg0: i32, %arg1: i32) -> (i32, i32, i32) {
    %c0_i32 = arith.constant 0 : i32
    %c0_i32_0 = arith.constant 0 : i32
    return %arg0, %c0_i32, %arg1 : i32, i32, i32
  }
}

module attributes {stable_mosaic.version = 11 : i64} {
  func.func @_bn_apply_kernel(%arg0: i32, %arg1: i32, %arg2: memref<1x19x256xf32, #tpu.memory_space<vmem>>, %arg3: memref<1x1x256xf32, #tpu.memory_space<vmem>>, %arg4: memref<4xf32, #tpu.memory_space<smem>>, %arg5: memref<1x19x256xf32, #tpu.memory_space<vmem>>, %arg6: memref<1x1x256xf32, #tpu.memory_space<vmem>>) attributes {dimension_semantics = [#tpu.dimension_semantics<parallel>, #tpu.dimension_semantics<parallel>], iteration_bounds = array<i64: 2, 1>, scalar_prefetch = 0 : i64, scratch_operands = 0 : i64, tpu.core_type = #tpu.core_type<tc>, window_params = [{transform_indices = @transform_0, window_bounds = array<i64: 1, 19, 256>}, {transform_indices = @transform_1, window_bounds = array<i64: 1, 1, 256>}, {transform_indices = @transform_2, window_bounds = array<i64: 4>}, {transform_indices = @transform_3, window_bounds = array<i64: 1, 19, 256>}, {transform_indices = @transform_4, window_bounds = array<i64: 1, 1, 256>}]} {
    %c0 = arith.constant 0 : index
    %0 = memref.load %arg4[%c0] : memref<4xf32, #tpu.memory_space<smem>>
    %c1 = arith.constant 1 : index
    %1 = memref.load %arg4[%c1] : memref<4xf32, #tpu.memory_space<smem>>
    %c2 = arith.constant 2 : index
    %2 = memref.load %arg4[%c2] : memref<4xf32, #tpu.memory_space<smem>>
    %c3 = arith.constant 3 : index
    %3 = memref.load %arg4[%c3] : memref<4xf32, #tpu.memory_space<smem>>
    %c0_0 = arith.constant 0 : index
    %c0_1 = arith.constant 0 : index
    %c0_2 = arith.constant 0 : index
    %4 = vector.load %arg3[%c0_0, %c0_1, %c0_2] : memref<1x1x256xf32, #tpu.memory_space<vmem>>, vector<1x1x256xf32>
    %5 = vector.shape_cast %4 : vector<1x1x256xf32> to vector<1x256xf32>
    %6 = vector.broadcast %0 : f32 to vector<1x256xf32>
    %7 = arith.subf %5, %6 : vector<1x256xf32>
    %8 = arith.mulf %1, %2 : f32
    %9 = vector.broadcast %8 : f32 to vector<1x256xf32>
    %10 = arith.mulf %7, %9 : vector<1x256xf32>
    %11 = vector.broadcast %3 : f32 to vector<1x256xf32>
    %12 = arith.addf %10, %11 : vector<1x256xf32>
    %13 = arith.negf %12 : vector<1x256xf32>
    %14 = math.exp %13 : vector<1x256xf32>
    %cst = arith.constant 1.000000e+00 : f32
    %15 = vector.broadcast %cst : f32 to vector<1x256xf32>
    %16 = arith.addf %15, %14 : vector<1x256xf32>
    %17 = arith.divf %15, %16 : vector<1x256xf32>
    %cst_3 = arith.constant 9.99999996E-13 : f32
    %18 = vector.broadcast %cst_3 : f32 to vector<1x256xf32>
    %19 = arith.addf %17, %18 : vector<1x256xf32>
    %cst_4 = arith.constant 1.000000e+00 : f32
    %20 = vector.broadcast %cst_4 : f32 to vector<1x256xf32>
    %21 = arith.divf %20, %19 : vector<1x256xf32>
    %c0_5 = arith.constant 0 : index
    %c0_6 = arith.constant 0 : index
    %c0_7 = arith.constant 0 : index
    %22 = vector.load %arg2[%c0_5, %c0_6, %c0_7] : memref<1x19x256xf32, #tpu.memory_space<vmem>>, vector<1x19x256xf32>
    %23 = vector.shape_cast %22 : vector<1x19x256xf32> to vector<19x256xf32>
    %24 = vector.broadcast %21 : vector<1x256xf32> to vector<19x256xf32>
    %25 = arith.mulf %23, %24 : vector<19x256xf32>
    %c0_8 = arith.constant 0 : index
    %c0_9 = arith.constant 0 : index
    %c0_10 = arith.constant 0 : index
    %26 = vector.load %arg5[%c0_8, %c0_9, %c0_10] : memref<1x19x256xf32, #tpu.memory_space<vmem>>, vector<1x19x256xf32>
    %27 = vector.shape_cast %26 : vector<1x19x256xf32> to vector<19x256xf32>
    %28 = vector.shape_cast %25 : vector<19x256xf32> to vector<1x19x256xf32>
    tpu.vector_store %arg5[%c0_8, %c0_9, %c0_10], %28 {strides = array<i32>} : memref<1x19x256xf32, #tpu.memory_space<vmem>>, vector<1x19x256xf32>,
    %c0_11 = arith.constant 0 : index
    %c0_12 = arith.constant 0 : index
    %c0_13 = arith.constant 0 : index
    %29 = vector.load %arg6[%c0_11, %c0_12, %c0_13] : memref<1x1x256xf32, #tpu.memory_space<vmem>>, vector<1x1x256xf32>
    %30 = vector.shape_cast %29 : vector<1x1x256xf32> to vector<1x256xf32>
    %31 = vector.shape_cast %19 : vector<1x256xf32> to vector<1x1x256xf32>
    tpu.vector_store %arg6[%c0_11, %c0_12, %c0_13], %31 {strides = array<i32>} : memref<1x1x256xf32, #tpu.memory_space<vmem>>, vector<1x1x256xf32>,
    return
  }
  func.func @transform_0(%arg0: i32, %arg1: i32) -> (i32, i32, i32) {
    %c0_i32 = arith.constant 0 : i32
    %c0_i32_0 = arith.constant 0 : i32
    return %arg0, %c0_i32, %arg1 : i32, i32, i32
  }
  func.func @transform_1(%arg0: i32, %arg1: i32) -> (i32, i32, i32) {
    %c0_i32 = arith.constant 0 : i32
    %c0_i32_0 = arith.constant 0 : i32
    return %arg0, %c0_i32, %arg1 : i32, i32, i32
  }
  func.func @transform_2(%arg0: i32, %arg1: i32) -> i32 {
    %c0_i32 = arith.constant 0 : i32
    %c0_i32_0 = arith.constant 0 : i32
    return %c0_i32 : i32
  }
  func.func @transform_3(%arg0: i32, %arg1: i32) -> (i32, i32, i32) {
    %c0_i32 = arith.constant 0 : i32
    %c0_i32_0 = arith.constant 0 : i32
    return %arg0, %c0_i32, %arg1 : i32, i32, i32
  }
  func.func @transform_4(%arg0: i32, %arg1: i32) -> (i32, i32, i32) {
    %c0_i32 = arith.constant 0 : i32
    %c0_i32_0 = arith.constant 0 : i32
    return %arg0, %c0_i32, %arg1 : i32, i32, i32
  }
}

</mosaic_0001>

<bundles_post_ra>
// kernel: learned_temperature_semseg_forward.3
= control target key start
LH: loop header
LB: loop body
LE: loop exit
PB: predicated region body
PF: predicated region fallthrough
CT: control target
= control target key end

     0   :  { %10 = vsyncpa [#allocation3], 0  ;;  %s667_s15 = smov 0   ;;  %s669_s16 = smov 0   ;;  %s718_s0 = inlined_call_operand.vmem [shape: f32[2,19,256], index: 0, kind: input, shape index: {}]   ;;  %s719_s1 = inlined_call_operand.vmem [shape: f32[2,1,256], index: 1, kind: input, shape index: {}, may-alias: {1,4}]   ;;  %s720_s2 = inlined_call_operand.vmem [shape: f32[4], index: 2, kind: input, shape index: {}]   ;;  %s721_s3 = inlined_call_operand.vmem [shape: f32[2,19,256], index: 3, kind: output, shape index: {0}]   ;;  %s722_s4 = inlined_call_operand.vmem [shape: f32[2,1,256], index: 4, kind: output, shape index: {1}, may-alias: {1,4}]  }
   0x1   :  { %s671_s17 = smov 0  }
   0x2 LB: > { %s539_s18 = sadd.s32 4294967295, %s639_s17   ;;  %s28_s19 = sadd.s32 1, %s635_s16  ;;  %s639_s17 = sphi %s671_s17, %s16_s17   ;;  %s635_s16 = sphi %s669_s16, %s724_s16   ;;  %s631_s15 = sphi %s667_s15, %s723_s15  }
   0x3   : > { %p30_p0 = scmp.ge.s32.totalorder %s28_s19, 2  ;;  %p541_p1 = scmp.ge.s32.totalorder %s639_s17, 1 }
   0x4   : > { %p166_p2 = scmp.lt.s32.totalorder %s639_s17, 3  ;;  %p565_p4 = scmp.eq.s32.totalorder %s539_s18, 0 }
   0x5   : > { %s726_s19 = smov (%p30_p0, %s28_s19), 0  ;;  %s178_s22 = sshll.u32 %s720_s2, 4  ;;  %s179_s22 = int_to_ptr.vmem [resolvable:$true] %s178_s22 }
   0x6   : > { %p167_p3 = pnand %p541_p1, %p166_p2  ;;  %s641_s23 = smov [#allocation2]  }
   0x8   : > { %p561_p5 = pneg %p167_p3  ;;  %216 = sbr.rel (%p167_p3) target bundleno = 88 (0x58), region = 32 }
   0xa   : > { %p562_p6 = pnand %p565_p4, %p561_p5 }
   0xc   : > { %564 = dma.vmem_to_smem (!%p562_p6), %s179_s22, 16, %s641_s23, [#allocation3]  }
   0xd   : > { %626 = dma.done.wait (%p565_p4), [#allocation3], 16  }
   0xe   : > { %628 = vsyncadd (%p565_p4), [#allocation3], 4294967280 }
   0xf   : > { %223 = sfence }
  0x10   : > { %p269_p7 = scmp.lt.s32.totalorder %s631_s15, 1  ;;  %s306_s24 = sld [smem:[#allocation2]]  ;;  %v376_v17 = vlaneseq }
  0x11   : > { %s550_s25 = sld [smem:[#allocation2 + $0x1]] }
  0x12   : > { %s728_s15 = smov (!%p269_p7, %s631_s15), 1  ;;  %s551_s26 = sld [smem:[#allocation2 + $0x2]]  ;;  %vm378_vm4 = vcmp.lt.s32.totalorder %v376_v17, 256 }
  0x13   : > { %s547_s27 = sshll.u32 %s728_s15, 1  ;;  %s552_s5 = sld [smem:[#allocation2 + $0x3]] }
  0x14   : > { %s285_s30 = scalar_lea.vmem %s719_s1, %s547_s27  ;;  %s304_s9 = scalar_lea.vmem %s722_s4, %s547_s27 }
  0x15   : > { %v310_v0 = vld [vmem:[%s285_s30] sm:$0x3]  ;;  %s556_s10 = smul.u32 48, %s728_s15 }
  0x16   : > { %v311_v1 = vstv %s306_s24 }
  0x17   : > { %v312_v2 = vsub.f32 %v310_v0, %v311_v1  ;;  %s276_s13 = scalar_lea.vmem %s718_s0, %s556_s10  ;;  %s295_s18 = scalar_lea.vmem %s721_s3, %s556_s10 }
  0x18   : > { %s313_s6 = smul.f32 %s551_s26, %s550_s25  ;;  %v353_v32 = vld [vmem:[%s276_s13] sm:$0xff]  ;;  %v354_v33 = vld [vmem:[%s276_s13 + $0x8] sm:$0xff]  ;;  %v355_v34 = vld [vmem:[%s276_s13 + $0x10] sm:$0xff] }
  0x19   : > { %v316_v4 = vstv %s552_s5  ;;  %v356_v37 = vld [vmem:[%s276_s13 + $0x18] sm:$0xff]  ;;  %v357_v38 = vld [vmem:[%s276_s13 + $0x20] sm:$0x7]  ;;  %v358_v42 = vld [vmem:[%s276_s13 + $0x28] sm:$0x7] }
  0x1a   : > { %v314_v3 = vstv %s313_s6 }
  0x1b   : > { %v315_v5 = vmul.f32 %v314_v3, %v312_v2 }
  0x1d   : > { %v317_v6 = vadd.f32 %v316_v4, %v315_v5 }
  0x1f   : > { %v553_v7 = vmul.f32 -1.442695, %v317_v6 }
  0x21   : > { %592 = vpow2.f32 %v553_v7 }
  0x27   : > { %v593_v8 = vpop.eup %592 }
  0x28   : > { %v321_v9 = vadd.f32 1.0, %v593_v8 }
  0x2a   : > { %594 = vrcp.f32 %v321_v9  ;;  %v333_v12 = vand.u32 2147483648, %v321_v9  ;;  %vm327_vm0 = vweird.f32 %v321_v9  ;;  %v331_v14 = vand.u32 2147483647, %v321_v9 }
  0x2c   : > { %v334_v16 = vor.u32 1.1754944e-38, %v333_v12  ;;  %vm332_vm3 = vcmp.eq.f32.partialorder %v331_v14, 8.507059e+37 }
  0x30   : > { %v595_v10 = vpop.eup %594 }
  0x31   : > { %v323_v11 = vmul.f32 %v595_v10, %v321_v9  ;;  %vm328_vm1 = vweird.f32 %v595_v10 }
  0x32   : > { %vm329_vm2 = vmor %vm327_vm0, %vm328_vm1 }
  0x33   : > { %v324_v13 = vsub.f32 1.0, %v323_v11 }
  0x35   : > { %v325_v15 = vmul.f32 %v595_v10, %v324_v13 }
  0x37   : > { %v326_v18 = vadd.f32 %v595_v10, %v325_v15 }
  0x39   : > { %v330_v19 = vsel %vm329_vm2, %v595_v10, %v326_v18 }
  0x3a   : > { %v335_v20 = vsel %vm332_vm3, %v334_v16, %v330_v19 }
  0x3b   : > { %v337_v21 = vadd.f32 1e-12, %v335_v20 }
  0x3d   : > { %596 = vrcp.f32 %v337_v21  ;;  %380 = vst.msk [vmem:[%s304_s9] sm:$0x3] %vm378_vm4, %v337_v21  ;;  %v349_v24 = vand.u32 2147483648, %v337_v21  ;;  %vm343_vm5 = vweird.f32 %v337_v21  ;;  %v347_v26 = vand.u32 2147483647, %v337_v21 }
  0x3f   : > { %v350_v28 = vor.u32 1.1754944e-38, %v349_v24  ;;  %vm348_vm8 = vcmp.eq.f32.partialorder %v347_v26, 8.507059e+37 }
  0x43   : > { %v597_v22 = vpop.eup %596 }
  0x44   : > { %v339_v23 = vmul.f32 %v597_v22, %v337_v21  ;;  %vm344_vm6 = vweird.f32 %v597_v22 }
  0x45   : > { %vm345_vm7 = vmor %vm343_vm5, %vm344_vm6 }
  0x46   : > { %v340_v25 = vsub.f32 1.0, %v339_v23 }
  0x48   : > { %v341_v27 = vmul.f32 %v597_v22, %v340_v25 }
  0x4a   : > { %v342_v29 = vadd.f32 %v597_v22, %v341_v27 }
  0x4c   : > { %v346_v30 = vsel %vm345_vm7, %v597_v22, %v342_v29 }
  0x4d   : > { %v351_v31 = vsel %vm348_vm8, %v350_v28, %v346_v30 }
  0x4e   : > { %v360_v35 = vperm.slane %v351_v31, 0  ;;  %v361_v36 = vperm.slane %v351_v31, 1 }
  0x50   : > { %v364_v39 = vmul.f32 %v360_v35, %v353_v32  ;;  %v365_v40 = vmul.f32 %v361_v36, %v354_v33  ;;  %v366_v41 = vmul.f32 %v360_v35, %v355_v34  ;;  %v367_v43 = vmul.f32 %v361_v36, %v356_v37 }
  0x51   : > { %v368_v44 = vmul.f32 %v360_v35, %v357_v38  ;;  %v369_v45 = vmul.f32 %v361_v36, %v358_v42 }
  0x52   : > { %370 = vst [vmem:[%s295_s18] sm:$0xff] %v364_v39 }
  0x53   : > { %371 = vst [vmem:[%s295_s18 + $0x8] sm:$0xff] %v365_v40 }
  0x54   : > { %372 = vst [vmem:[%s295_s18 + $0x10] sm:$0xff] %v366_v41 }
  0x55   : > { %373 = vst [vmem:[%s295_s18 + $0x18] sm:$0xff] %v367_v43 }
  0x56   : > { %374 = vst [vmem:[%s295_s18 + $0x20] sm:$0x7] %v368_v44 }
  0x57   : > { %375 = vst [vmem:[%s295_s18 + $0x28] sm:$0x7] %v369_v45 }
  0x58 PF: > { %s16_s17 = sadd.s32 1, %s639_s17   ;;  %s723_s15 = smov %s635_s16 }
  0x59   : > { %p13_p8 = scmp.ge.s32.totalorder %s16_s17, 4   ;;  %s724_s16 = smov %s726_s19 }
  0x5b   :  { %15 = sbr.rel (!%p13_p8) target bundleno = 2 (0x2), region = 82 }
  0x60   :  { %434 = vsyncpa [#allocation3], 1 }
  0x61   :  { %436 = vsyncpa [#allocation3 + $0x1], 1 }

// kernel: learned_temperature_semseg_forward.2
= control target key start
LH: loop header
LB: loop body
LE: loop exit
PB: predicated region body
PF: predicated region fallthrough
CT: control target
= control target key end

     0   :  { %s1096_s12 = smov 0   ;;  %s1098_s13 = smov 0   ;;  %s1422_s0 = inlined_call_operand.vmem [shape: f32[2,256,256], index: 0, kind: input, shape index: {}]   ;;  %s1423_s1 = inlined_call_operand.vmem [shape: bf16[27,256], index: 1, kind: input, shape index: {}]   ;;  %s1424_s2 = inlined_call_operand.vmem [shape: f32[2,19,256], index: 2, kind: output, shape index: {0}]   ;;  %s1425_s3 = inlined_call_operand.vmem [shape: f32[2,1,256], index: 3, kind: output, shape index: {1}]  }
   0x1   :  { %s1100_s14 = smov 0  }
   0x2 LB: > { %s26_s15 = sadd.s32 1, %s1069_s13  ;;  %p989_p0 = scmp.ge.s32.totalorder %s1073_s14, 1  ;;  %s1073_s14 = sphi %s1100_s14, %s14_s14   ;;  %s1069_s13 = sphi %s1098_s13, %s1427_s13   ;;  %s1065_s12 = sphi %s1096_s12, %s1426_s12  }
   0x3   : > { %p28_p1 = scmp.ge.s32.totalorder %s26_s15, 2  ;;  %p163_p2 = scmp.lt.s32.totalorder %s1073_s14, 3 }
   0x5   : > { %s1429_s15 = smov (%p28_p1, %s26_s15), 0  ;;  %p164_p3 = pnand %p989_p0, %p163_p2 }
   0x6   : > { %p204_p4 = scmp.lt.s32.totalorder (!%p164_p3), %s1065_s12, 1 }
   0x7   : > { %167 = sbr.rel (%p164_p3) target bundleno = 265 (0x109), region = 28 }
   0xc   : > { %s1431_s12 = smov (!%p204_p4, %s1065_s12), 1  ;;  %vm846_vm0 = vcmask 1040384  }
   0xd   : > { %s1012_s16 = sshll.u32 %s1431_s12, 9  ;;  %s993_s9 = sshll.u32 %s1431_s12, 1 }
   0xe   : > { %s1120_s19 = scalar_lea.vmem %s1422_s0, %s1012_s16  ;;  %s230_s16 = scalar_lea.vmem %s1425_s3, %s993_s9 }
   0xf   : > { %v261_v0 = vld [vmem:[%s1120_s19 + $0xe0] sm:$0xff]  ;;  %v262_v1 = vld [vmem:[%s1120_s19 + $0xe8] sm:$0xff]  ;;  %v263_v2 = vld [vmem:[%s1120_s19 + $0xf0] sm:$0xff]  ;;  %s1017_s17 = smul.u32 48, %s1431_s12 }
  0x10   : > { %v264_v3 = vld [vmem:[%s1120_s19 + $0xf8] sm:$0xff]  ;;  %v1126_v4 = vpack.c.bf16 %v262_v1, %v261_v0  ;;  %v293_v5 = vld [vmem:[%s1120_s19 + $0x1e0] sm:$0xff]  ;;  %v294_v6 = vld [vmem:[%s1120_s19 + $0x1e8] sm:$0xff] }
  0x11   : > { %v1130_v7 = vpack.c.bf16 %v264_v3, %v263_v2  ;;  %v295_v8 = vld [vmem:[%s1120_s19 + $0x1f0] sm:$0xff]  ;;  %v296_v9 = vld [vmem:[%s1120_s19 + $0x1f8] sm:$0xff]  ;;  %v1134_v10 = vpack.c.bf16 %v294_v6, %v293_v5  ;;  %v257_v11 = vld [vmem:[%s1120_s19 + $0xc0] sm:$0xff]  ;;  %s221_s20 = scalar_lea.vmem %s1424_s2, %s1017_s17 }
  0x12   : > { %v413_v12 = vunpack.c.l.b16 %v1126_v4  ;;  %v1138_v13 = vpack.c.bf16 %v296_v9, %v295_v8  ;;  %v414_v14 = vunpack.c.h.b16 %v1126_v4  ;;  %v258_v15 = vld [vmem:[%s1120_s19 + $0xc8] sm:$0xff]  ;;  %v259_v16 = vld [vmem:[%s1120_s19 + $0xd0] sm:$0xff]  ;;  %v260_v17 = vld [vmem:[%s1120_s19 + $0xd8] sm:$0xff]  ;;  %v618_v18 = vunpack.c.h.bf16 %v1126_v4 }
  0x13   : > { %v415_v19 = vunpack.c.l.b16 %v1130_v7  ;;  %v445_v20 = vunpack.c.l.b16 %v1134_v10  ;;  %v416_v21 = vunpack.c.h.b16 %v1130_v7  ;;  %v446_v22 = vunpack.c.h.b16 %v1134_v10  ;;  %v289_v23 = vld [vmem:[%s1120_s19 + $0x1c0] sm:$0xff]  ;;  %v290_v24 = vld [vmem:[%s1120_s19 + $0x1c8] sm:$0xff]  ;;  %v291_v25 = vld [vmem:[%s1120_s19 + $0x1d0] sm:$0xff] }
  0x14   : > { %v447_v26 = vunpack.c.l.b16 %v1138_v13  ;;  %v448_v27 = vunpack.c.h.b16 %v1138_v13  ;;  %v1154_v28 = vpack.c.bf16 %v258_v15, %v257_v11  ;;  %v1156_v29 = vpack.c.bf16 %v260_v17, %v259_v16  ;;  %v292_v30 = vld [vmem:[%s1120_s19 + $0x1d8] sm:$0xff]  ;;  %v253_v35 = vld [vmem:[%s1120_s19 + $0xa0] sm:$0xff]  ;;  %v254_v36 = vld [vmem:[%s1120_s19 + $0xa8] sm:$0xff] }
  0x15   : > { %v463_v31 = vpack.c.b16 %v415_v19, %v413_v12  ;;  %v464_v32 = vpack.c.b16 %v416_v21, %v414_v14  ;;  %v1159_v33 = vpack.c.bf16 %v290_v24, %v289_v23  ;;  %v1161_v34 = vpack.c.bf16 %v292_v30, %v291_v25  ;;  %v255_v37 = vld [vmem:[%s1120_s19 + $0xb0] sm:$0xff]  ;;  %v256_v42 = vld [vmem:[%s1120_s19 + $0xb8] sm:$0xff]  ;;  %v285_v43 = vld [vmem:[%s1120_s19 + $0x1a0] sm:$0xff] }
  0x16   : > { %v479_v38 = vpack.c.b16 %v447_v26, %v445_v20  ;;  %v480_v39 = vpack.c.b16 %v448_v27, %v446_v22  ;;  %v409_v40 = vunpack.c.l.b16 %v1154_v28  ;;  %v411_v41 = vunpack.c.l.b16 %v1156_v29  ;;  %v286_v44 = vld [vmem:[%s1120_s19 + $0x1a8] sm:$0xff]  ;;  %v287_v49 = vld [vmem:[%s1120_s19 + $0x1b0] sm:$0xff]  ;;  %v288_v50 = vld [vmem:[%s1120_s19 + $0x1b8] sm:$0xff] }
  0x17   : > { %513 = vmatpush.bf16.msra.mxu0 %v463_v31  ;;  %551 = vmatpush.bf16.msra.mxu2 %v464_v32  ;;  %v441_v45 = vunpack.c.l.b16 %v1159_v33  ;;  %v443_v46 = vunpack.c.l.b16 %v1161_v34  ;;  %v410_v47 = vunpack.c.h.b16 %v1154_v28  ;;  %v412_v48 = vunpack.c.h.b16 %v1156_v29  ;;  %v249_v55 = vld [vmem:[%s1120_s19 + $0x80] sm:$0xff]  ;;  %v250_v56 = vld [vmem:[%s1120_s19 + $0x88] sm:$0xff]  ;;  %v251_v61 = vld [vmem:[%s1120_s19 + $0x90] sm:$0xff] }
  0x18   : > { %532 = vmatpush.bf16.msra.mxu1 %v479_v38  ;;  %570 = vmatpush.bf16.msra.mxu3 %v480_v39  ;;  %v461_v51 = vpack.c.b16 %v411_v41, %v409_v40  ;;  %v442_v52 = vunpack.c.h.b16 %v1159_v33  ;;  %v444_v53 = vunpack.c.h.b16 %v1161_v34  ;;  %v1179_v54 = vpack.c.bf16 %v254_v36, %v253_v35  ;;  %v252_v62 = vld [vmem:[%s1120_s19 + $0x98] sm:$0xff]  ;;  %v281_v63 = vld [vmem:[%s1120_s19 + $0x180] sm:$0xff]  ;;  %v282_v5 = vld [vmem:[%s1120_s19 + $0x188] sm:$0xff] }
  0x19   : > { %v477_v57 = vpack.c.b16 %v443_v46, %v441_v45  ;;  %v462_v58 = vpack.c.b16 %v412_v48, %v410_v47  ;;  %v1183_v59 = vpack.c.bf16 %v256_v42, %v255_v37  ;;  %v1185_v60 = vpack.c.bf16 %v286_v44, %v285_v43  ;;  %v283_v6 = vld [vmem:[%s1120_s19 + $0x190] sm:$0xff]  ;;  %v284_v8 = vld [vmem:[%s1120_s19 + $0x198] sm:$0xff]  ;;  %v245_v24 = vld [vmem:[%s1120_s19 + $0x60] sm:$0xff] }
  0x1a   : > { %v478_v0 = vpack.c.b16 %v444_v53, %v442_v52  ;;  %v405_v1 = vunpack.c.l.b16 %v1179_v54  ;;  %v1191_v2 = vpack.c.bf16 %v288_v50, %v287_v49  ;;  %v406_v3 = vunpack.c.h.b16 %v1179_v54  ;;  %v246_v25 = vld [vmem:[%s1120_s19 + $0x68] sm:$0xff]  ;;  %v247_v26 = vld [vmem:[%s1120_s19 + $0x70] sm:$0xff]  ;;  %v248_v35 = vld [vmem:[%s1120_s19 + $0x78] sm:$0xff] }
  0x1b   : > { %514 = vmatpush.bf16.msra.mxu0 %v461_v51  ;;  %552 = vmatpush.bf16.msra.mxu2 %v462_v58  ;;  %v407_v9 = vunpack.c.l.b16 %v1183_v59  ;;  %v437_v11 = vunpack.c.l.b16 %v1185_v60  ;;  %v408_v12 = vunpack.c.h.b16 %v1183_v59  ;;  %v438_v14 = vunpack.c.h.b16 %v1185_v60  ;;  %v277_v36 = vld [vmem:[%s1120_s19 + $0x160] sm:$0xff]  ;;  %v278_v37 = vld [vmem:[%s1120_s19 + $0x168] sm:$0xff]  ;;  %v279_v42 = vld [vmem:[%s1120_s19 + $0x170] sm:$0xff] }
  0x1c   : > { %533 = vmatpush.bf16.msra.mxu1 %v477_v57  ;;  %571 = vmatpush.bf16.msra.mxu3 %v478_v0  ;;  %v439_v15 = vunpack.c.l.b16 %v1191_v2  ;;  %v440_v16 = vunpack.c.h.b16 %v1191_v2  ;;  %v1203_v17 = vpack.c.bf16 %v250_v56, %v249_v55  ;;  %v1205_v19 = vpack.c.bf16 %v252_v62, %v251_v61  ;;  %v280_v43 = vld [vmem:[%s1120_s19 + $0x178] sm:$0xff]  ;;  %v241_v48 = vld [vmem:[%s1120_s19 + $0x40] sm:$0xff]  ;;  %v242_v49 = vld [vmem:[%s1120_s19 + $0x48] sm:$0xff] }
  0x1d   : > { %v459_v20 = vpack.c.b16 %v407_v9, %v405_v1  ;;  %v460_v21 = vpack.c.b16 %v408_v12, %v406_v3  ;;  %v1207_v22 = vpack.c.bf16 %v282_v5, %v281_v63  ;;  %v1209_v23 = vpack.c.bf16 %v284_v8, %v283_v6  ;;  %v243_v55 = vld [vmem:[%s1120_s19 + $0x50] sm:$0xff]  ;;  %v244_v56 = vld [vmem:[%s1120_s19 + $0x58] sm:$0xff]  ;;  %v273_v57 = vld [vmem:[%s1120_s19 + $0x140] sm:$0xff] }
  0x1e   : > { %v475_v27 = vpack.c.b16 %v439_v15, %v437_v11  ;;  %v476_v30 = vpack.c.b16 %v440_v16, %v438_v14  ;;  %v401_v31 = vunpack.c.l.b16 %v1203_v17  ;;  %v403_v32 = vunpack.c.l.b16 %v1205_v19  ;;  %v274_v0 = vld [vmem:[%s1120_s19 + $0x148] sm:$0xff]  ;;  %v275_v1 = vld [vmem:[%s1120_s19 + $0x150] sm:$0xff]  ;;  %v276_v3 = vld [vmem:[%s1120_s19 + $0x158] sm:$0xff] }
  0x1f   : > { %515 = vmatpush.bf16.msra.mxu0 %v459_v20  ;;  %553 = vmatpush.bf16.msra.mxu2 %v460_v21  ;;  %v433_v38 = vunpack.c.l.b16 %v1207_v22  ;;  %v435_v39 = vunpack.c.l.b16 %v1209_v23  ;;  %v402_v40 = vunpack.c.h.b16 %v1203_v17  ;;  %v404_v41 = vunpack.c.h.b16 %v1205_v19 }
  0x20   : > { %534 = vmatpush.bf16.msra.mxu1 %v475_v27  ;;  %572 = vmatpush.bf16.msra.mxu3 %v476_v30  ;;  %v457_v44 = vpack.c.b16 %v403_v32, %v401_v31  ;;  %v434_v45 = vunpack.c.h.b16 %v1207_v22  ;;  %v436_v46 = vunpack.c.h.b16 %v1209_v23  ;;  %v1227_v47 = vpack.c.bf16 %v246_v25, %v245_v24  ;;  %v237_v25 = vld [vmem:[%s1120_s19 + $0x20] sm:$0xff]  ;;  %v239_v27 = vld [vmem:[%s1120_s19 + $0x30] sm:$0xff] }
  0x21   : > { %v473_v50 = vpack.c.b16 %v435_v39, %v433_v38  ;;  %v458_v51 = vpack.c.b16 %v404_v41, %v402_v40  ;;  %v1231_v52 = vpack.c.bf16 %v248_v35, %v247_v26  ;;  %v1233_v53 = vpack.c.bf16 %v278_v37, %v277_v36  ;;  %v238_v26 = vld [vmem:[%s1120_s19 + $0x28] sm:$0xff]  ;;  %v240_v36 = vld [vmem:[%s1120_s19 + $0x38] sm:$0xff]  ;;  %v269_v37 = vld [vmem:[%s1120_s19 + $0x120] sm:$0xff] }
  0x22   : > { %v474_v58 = vpack.c.b16 %v436_v46, %v434_v45  ;;  %v397_v61 = vunpack.c.l.b16 %v1227_v47  ;;  %v1239_v62 = vpack.c.bf16 %v280_v43, %v279_v42  ;;  %v398_v63 = vunpack.c.h.b16 %v1227_v47  ;;  %v270_v38 = vld [vmem:[%s1120_s19 + $0x128] sm:$0xff]  ;;  %v271_v43 = vld [vmem:[%s1120_s19 + $0x130] sm:$0xff] }
  0x23   : > { %516 = vmatpush.bf16.msra.mxu0 %v457_v44  ;;  %554 = vmatpush.bf16.msra.mxu2 %v458_v51  ;;  %v399_v5 = vunpack.c.l.b16 %v1231_v52  ;;  %v429_v6 = vunpack.c.l.b16 %v1233_v53  ;;  %v400_v8 = vunpack.c.h.b16 %v1231_v52  ;;  %v430_v9 = vunpack.c.h.b16 %v1233_v53  ;;  %v272_v44 = vld [vmem:[%s1120_s19 + $0x138] sm:$0xff]  ;;  %v234_v51 = vld [vmem:[%s1120_s19 + $0x8] sm:$0xff] }
  0x24   : > { %535 = vmatpush.bf16.msra.mxu1 %v473_v50  ;;  %573 = vmatpush.bf16.msra.mxu3 %v474_v58  ;;  %v431_v11 = vunpack.c.l.b16 %v1239_v62  ;;  %v432_v12 = vunpack.c.h.b16 %v1239_v62  ;;  %v1251_v14 = vpack.c.bf16 %v242_v49, %v241_v48  ;;  %v1253_v15 = vpack.c.bf16 %v244_v56, %v243_v55  ;;  %v233_v50 = vld [vmem:[%s1120_s19] sm:$0xff] }
  0x25   : > { %v455_v16 = vpack.c.b16 %v399_v5, %v397_v61  ;;  %v456_v20 = vpack.c.b16 %v400_v8, %v398_v63  ;;  %v1255_v21 = vpack.c.bf16 %v274_v0, %v273_v57  ;;  %v1257_v24 = vpack.c.bf16 %v276_v3, %v275_v1  ;;  %v235_v61 = vld [vmem:[%s1120_s19 + $0x10] sm:$0xff]  ;;  %v236_v63 = vld [vmem:[%s1120_s19 + $0x18] sm:$0xff]  ;;  %v265_v0 = vld [vmem:[%s1120_s19 + $0x100] sm:$0xff] }
  0x26   : > { %v471_v30 = vpack.c.b16 %v431_v11, %v429_v6  ;;  %v472_v31 = vpack.c.b16 %v432_v12, %v430_v9  ;;  %v393_v32 = vunpack.c.l.b16 %v1251_v14  ;;  %v395_v35 = vunpack.c.l.b16 %v1253_v15  ;;  %v266_v8 = vld [vmem:[%s1120_s19 + $0x108] sm:$0xff]  ;;  %v267_v9 = vld [vmem:[%s1120_s19 + $0x110] sm:$0xff]  ;;  %v268_v11 = vld [vmem:[%s1120_s19 + $0x118] sm:$0xff] }
  0x27   : > { %517 = vmatpush.bf16.msra.mxu0 %v455_v16  ;;  %555 = vmatpush.bf16.msra.mxu2 %v456_v20  ;;  %v425_v39 = vunpack.c.l.b16 %v1255_v21  ;;  %v427_v40 = vunpack.c.l.b16 %v1257_v24  ;;  %v394_v41 = vunpack.c.h.b16 %v1251_v14  ;;  %v396_v42 = vunpack.c.h.b16 %v1253_v15 }
  0x28   : > { %536 = vmatpush.bf16.msra.mxu1 %v471_v30  ;;  %574 = vmatpush.bf16.msra.mxu3 %v472_v31  ;;  %v453_v45 = vpack.c.b16 %v395_v35, %v393_v32  ;;  %v426_v46 = vunpack.c.h.b16 %v1255_v21  ;;  %v428_v48 = vunpack.c.h.b16 %v1257_v24  ;;  %v1275_v49 = vpack.c.bf16 %v238_v26, %v237_v25 }
  0x29   : > { %v469_v55 = vpack.c.b16 %v427_v40, %v425_v39  ;;  %v454_v56 = vpack.c.b16 %v396_v42, %v394_v41  ;;  %v1279_v57 = vpack.c.bf16 %v240_v36, %v239_v27  ;;  %v1281_v58 = vpack.c.bf16 %v270_v38, %v269_v37  ;;  %v996_v38 = vld [vmem:[%s1423_s1] sm:$0xf]  ;;  %v1014_v39 = vld [vmem:[%s1423_s1 + $0x4] sm:$0xf0] }
  0x2a   : > { %v470_v1 = vpack.c.b16 %v428_v48, %v426_v46  ;;  %v389_v3 = vunpack.c.l.b16 %v1275_v49  ;;  %v1287_v5 = vpack.c.bf16 %v272_v44, %v271_v43  ;;  %v390_v6 = vunpack.c.h.b16 %v1275_v49  ;;  %v1013_v44 = vld [vmem:[%s1423_s1 + $0x4] sm:$0xf] }
  0x2b   : > { %518 = vmatpush.bf16.msra.mxu0 %v453_v45  ;;  %556 = vmatpush.bf16.msra.mxu2 %v454_v56  ;;  %v391_v12 = vunpack.c.l.b16 %v1279_v57  ;;  %v421_v16 = vunpack.c.l.b16 %v1281_v58  ;;  %v392_v20 = vunpack.c.h.b16 %v1279_v57  ;;  %v422_v25 = vunpack.c.h.b16 %v1281_v58  ;;  %v998_v45 = vld [vmem:[%s1423_s1 + $0x8] sm:$0xf0] }
  0x2c   : > { %537 = vmatpush.bf16.msra.mxu1 %v469_v55  ;;  %575 = vmatpush.bf16.msra.mxu3 %v470_v1  ;;  %v423_v26 = vunpack.c.l.b16 %v1287_v5  ;;  %v424_v27 = vunpack.c.h.b16 %v1287_v5  ;;  %v1299_v30 = vpack.c.bf16 %v234_v51, %v233_v50  ;;  %v1301_v31 = vpack.c.bf16 %v236_v63, %v235_v61 }
  0x2d   : > { %v451_v32 = vpack.c.b16 %v391_v12, %v389_v3  ;;  %v452_v35 = vpack.c.b16 %v392_v20, %v390_v6  ;;  %v1303_v36 = vpack.c.bf16 %v266_v8, %v265_v0  ;;  %v1305_v37 = vpack.c.bf16 %v268_v11, %v267_v9 }
  0x2e   : > { %v467_v40 = vpack.c.b16 %v423_v26, %v421_v16  ;;  %v468_v41 = vpack.c.b16 %v424_v27, %v422_v25  ;;  %v385_v42 = vunpack.c.l.b16 %v1299_v30  ;;  %v387_v43 = vunpack.c.l.b16 %v1301_v31 }
  0x2f   : > { %519 = vmatpush.bf16.msra.mxu0 %v451_v32  ;;  %557 = vmatpush.bf16.msra.mxu2 %v452_v35  ;;  %v417_v46 = vunpack.c.l.b16 %v1303_v36  ;;  %v419_v48 = vunpack.c.l.b16 %v1305_v37  ;;  %v386_v50 = vunpack.c.h.b16 %v1299_v30  ;;  %v388_v51 = vunpack.c.h.b16 %v1301_v31 }
  0x30   : > { %538 = vmatpush.bf16.msra.mxu1 %v467_v40  ;;  %576 = vmatpush.bf16.msra.mxu3 %v468_v41  ;;  %v449_v55 = vpack.c.b16 %v387_v43, %v385_v42  ;;  %v418_v56 = vunpack.c.h.b16 %v1303_v36  ;;  %v420_v61 = vunpack.c.h.b16 %v1305_v37  ;;  %v997_v63 = vor.u32 %v1014_v39, %v996_v38 }
  0x31   : > { %v465_v0 = vpack.c.b16 %v419_v48, %v417_v46  ;;  %v450_v1 = vpack.c.b16 %v388_v51, %v386_v50  ;;  %v1001_v3 = vor.u32 %v1013_v44, %v998_v45  ;;  %v620_v6 = vunpack.c.h.bf16 %v1130_v7 }
  0x32   : > { %v466_v8 = vpack.c.b16 %v420_v61, %v418_v56  ;;  %v682_v9 = vmul.f32 %v618_v18, %v618_v18  ;;  %v650_v11 = vunpack.c.h.bf16 %v1134_v10  ;;  %v652_v12 = vunpack.c.h.bf16 %v1138_v13 }
  0x33   : > { %520 = vmatpush.bf16.msra.mxu0 %v449_v55  ;;  %558 = vmatpush.bf16.msra.mxu2 %v450_v1  ;;  %v684_v16 = vmul.f32 %v620_v6, %v620_v6  ;;  %v617_v20 = vunpack.c.l.bf16 %v1126_v4  ;;  %v619_v25 = vunpack.c.l.bf16 %v1130_v7  ;;  %v649_v26 = vunpack.c.l.bf16 %v1134_v10 }
  0x34   : > { %539 = vmatpush.bf16.msra.mxu1 %v465_v0  ;;  %577 = vmatpush.bf16.msra.mxu3 %v466_v8  ;;  %v714_v27 = vmul.f32 %v650_v11, %v650_v11  ;;  %v716_v32 = vmul.f32 %v652_v12, %v652_v12  ;;  %v651_v35 = vunpack.c.l.bf16 %v1138_v13  ;;  %v614_v18 = vunpack.c.h.bf16 %v1154_v28 }
  0x35   : > { %v732_v38 = vpack.c.bf16 %v684_v16, %v682_v9  ;;  %v681_v39 = vmul.f32 %v617_v20, %v617_v20  ;;  %v683_v40 = vmul.f32 %v619_v25, %v619_v25  ;;  %v713_v41 = vmul.f32 %v649_v26, %v649_v26 }
  0x36   : > { %521 = vmatmul.bf16.vlgmr.msra.gmra.mxu0 %v997_v63  ;;  %559 = vmatmul.bf16.vlgmr.msra.gmra.mxu2 %v997_v63  ;;  %v748_v42 = vpack.c.bf16 %v716_v32, %v714_v27  ;;  %v715_v4 = vmul.f32 %v651_v35, %v651_v35  ;;  %v616_v7 = vunpack.c.h.bf16 %v1156_v29  ;;  %v678_v43 = vmul.f32 %v614_v18, %v614_v18 }
  0x37   : > { %540 = vmatmul.bf16.vlgmr.msra.gmra.mxu1 %v1001_v3  ;;  %578 = vmatmul.bf16.vlgmr.msra.gmra.mxu3 %v1001_v3  ;;  %v731_v10 = vpack.c.bf16 %v683_v40, %v681_v39  ;;  %v646_v44 = vunpack.c.h.bf16 %v1159_v33  ;;  %v648_v13 = vunpack.c.h.bf16 %v1161_v34  ;;  %v613_v45 = vunpack.c.l.bf16 %v1154_v28 }
  0x38   : > { %775 = vmatpush.bf16.msrb.mxu2 %v732_v38  ;;  %788 = vmatpush.bf16.msrb.mxu3 %v748_v42  ;;  %v747_v46 = vpack.c.bf16 %v715_v4, %v713_v41  ;;  %v680_v48 = vmul.f32 %v616_v7, %v616_v7  ;;  %v615_v50 = vunpack.c.l.bf16 %v1156_v29  ;;  %v645_v51 = vunpack.c.l.bf16 %v1159_v33 }
  0x39   : > { %749 = vmatpush.bf16.msrb.mxu0 %v731_v10  ;;  %v710_v55 = vmul.f32 %v646_v44, %v646_v44  ;;  %v712_v56 = vmul.f32 %v648_v13, %v648_v13  ;;  %v677_v61 = vmul.f32 %v613_v45, %v613_v45  ;;  %v647_v63 = vunpack.c.l.bf16 %v1161_v34  ;;  %v1016_v44 = vld [vmem:[%s1423_s1 + $0x14] sm:$0x30]  ;;  %v1015_v13 = vld [vmem:[%s1423_s1 + $0x14] sm:$0xf]  ;;  %v1006_v45 = vld [vmem:[%s1423_s1 + $0x18] sm:$0x30] }
  0x3a   : > { %762 = vmatpush.bf16.msrb.mxu1 %v747_v46  ;;  %v730_v0 = vpack.c.bf16 %v680_v48, %v678_v43  ;;  %v679_v1 = vmul.f32 %v615_v50, %v615_v50  ;;  %v709_v3 = vmul.f32 %v645_v51, %v645_v51  ;;  %v610_v28 = vunpack.c.h.bf16 %v1179_v54 }
  0x3b   : > { %v746_v6 = vpack.c.bf16 %v712_v56, %v710_v55  ;;  %v711_v8 = vmul.f32 %v647_v63, %v647_v63  ;;  %v612_v9 = vunpack.c.h.bf16 %v1183_v59  ;;  %v642_v29 = vunpack.c.h.bf16 %v1185_v60 }
  0x3c   : > { %776 = vmatpush.bf16.msrb.mxu2 %v730_v0  ;;  %v729_v33 = vpack.c.bf16 %v679_v1, %v677_v61  ;;  %v674_v11 = vmul.f32 %v610_v28, %v610_v28  ;;  %v644_v12 = vunpack.c.h.bf16 %v1191_v2  ;;  %v609_v16 = vunpack.c.l.bf16 %v1179_v54 }
  0x3d   : > { %789 = vmatpush.bf16.msrb.mxu3 %v746_v6  ;;  %v745_v34 = vpack.c.bf16 %v711_v8, %v709_v3  ;;  %v676_v20 = vmul.f32 %v612_v9, %v612_v9  ;;  %v706_v25 = vmul.f32 %v642_v29, %v642_v29  ;;  %v611_v26 = vunpack.c.l.bf16 %v1183_v59  ;;  %v1004_v59 = vld [vmem:[%s1423_s1 + $0x10] sm:$0xf] }
  0x3e   : > { %750 = vmatpush.bf16.msrb.mxu0 %v729_v33  ;;  %v708_v27 = vmul.f32 %v644_v12, %v644_v12  ;;  %v673_v32 = vmul.f32 %v609_v16, %v609_v16  ;;  %v641_v35 = vunpack.c.l.bf16 %v1185_v60  ;;  %v643_v18 = vunpack.c.l.bf16 %v1191_v2 }
  0x3f   : > { %763 = vmatpush.bf16.msrb.mxu1 %v745_v34  ;;  %v728_v38 = vpack.c.bf16 %v676_v20, %v674_v11  ;;  %v675_v39 = vmul.f32 %v611_v26, %v611_v26  ;;  %v606_v40 = vunpack.c.h.bf16 %v1203_v17  ;;  %v608_v54 = vunpack.c.h.bf16 %v1205_v19 }
  0x40   : > { %v744_v41 = vpack.c.bf16 %v708_v27, %v706_v25  ;;  %v705_v42 = vmul.f32 %v641_v35, %v641_v35  ;;  %v707_v4 = vmul.f32 %v643_v18, %v643_v18  ;;  %v638_v7 = vunpack.c.h.bf16 %v1207_v22 }
  0x41   : > { %777 = vmatpush.bf16.msrb.mxu2 %v728_v38  ;;  %v727_v60 = vpack.c.bf16 %v675_v39, %v673_v32  ;;  %v670_v43 = vmul.f32 %v606_v40, %v606_v40  ;;  %v672_v2 = vmul.f32 %v608_v54, %v608_v54  ;;  %v640_v10 = vunpack.c.h.bf16 %v1209_v23 }
  0x42   : > { %790 = vmatpush.bf16.msrb.mxu3 %v744_v41  ;;  %v743_v46 = vpack.c.bf16 %v707_v4, %v705_v42  ;;  %v702_v48 = vmul.f32 %v638_v7, %v638_v7  ;;  %v605_v50 = vunpack.c.l.bf16 %v1203_v17  ;;  %v607_v51 = vunpack.c.l.bf16 %v1205_v19 }
  0x43   : > { %751 = vmatpush.bf16.msrb.mxu0 %v727_v60  ;;  %v726_v55 = vpack.c.bf16 %v672_v2, %v670_v43  ;;  %v704_v56 = vmul.f32 %v640_v10, %v640_v10  ;;  %v637_v61 = vunpack.c.l.bf16 %v1207_v22  ;;  %v639_v63 = vunpack.c.l.bf16 %v1209_v23 }
  0x44   : > { %764 = vmatpush.bf16.msrb.mxu1 %v743_v46  ;;  %v669_v0 = vmul.f32 %v605_v50, %v605_v50  ;;  %v671_v1 = vmul.f32 %v607_v51, %v607_v51  ;;  %v1005_v3 = vor.u32 %v1016_v44, %v1004_v59  ;;  %v1009_v28 = vor.u32 %v1015_v13, %v1006_v45 }
  0x45   : > { %778 = vmatpush.bf16.msrb.mxu2 %v726_v55  ;;  %v742_v6 = vpack.c.bf16 %v704_v56, %v702_v48  ;;  %v701_v8 = vmul.f32 %v637_v61, %v637_v61  ;;  %v703_v9 = vmul.f32 %v639_v63, %v639_v63  ;;  %v602_v17 = vunpack.c.h.bf16 %v1227_v47 }
  0x46   : > { %v725_v29 = vpack.c.bf16 %v671_v1, %v669_v0  ;;  %526 = vmatmul.bf16.gmra.mxu0 %v1005_v3  ;;  %564 = vmatmul.bf16.gmra.mxu2 %v1005_v3  ;;  %v604_v19 = vunpack.c.h.bf16 %v1231_v52  ;;  %v634_v22 = vunpack.c.h.bf16 %v1233_v53  ;;  %v636_v23 = vunpack.c.h.bf16 %v1239_v62 }
  0x47   : > { %791 = vmatpush.bf16.msrb.mxu3 %v742_v6  ;;  %v741_v33 = vpack.c.bf16 %v703_v9, %v701_v8  ;;  %545 = vmatmul.bf16.gmra.mxu1 %v1009_v28  ;;  %v666_v11 = vmul.f32 %v602_v17, %v602_v17  ;;  %v601_v12 = vunpack.c.l.bf16 %v1227_v47  ;;  %v603_v16 = vunpack.c.l.bf16 %v1231_v52 }
  0x48   : > { %752 = vmatpush.bf16.msrb.mxu0 %v725_v29  ;;  %583 = vmatmul.bf16.gmra.mxu3 %v1009_v28  ;;  %v668_v34 = vmul.f32 %v604_v19, %v604_v19  ;;  %v698_v20 = vmul.f32 %v634_v22, %v634_v22  ;;  %v700_v25 = vmul.f32 %v636_v23, %v636_v23  ;;  %v633_v26 = vunpack.c.l.bf16 %v1233_v53 }
  0x49   : > { %765 = vmatpush.bf16.msrb.mxu1 %v741_v33  ;;  %v665_v27 = vmul.f32 %v601_v12, %v601_v12  ;;  %v667_v32 = vmul.f32 %v603_v16, %v603_v16  ;;  %v635_v35 = vunpack.c.l.bf16 %v1239_v62  ;;  %v598_v18 = vunpack.c.h.bf16 %v1251_v14 }
  0x4a   : > { %v724_v38 = vpack.c.bf16 %v668_v34, %v666_v11  ;;  %v740_v39 = vpack.c.bf16 %v700_v25, %v698_v20  ;;  %v697_v40 = vmul.f32 %v633_v26, %v633_v26  ;;  %v600_v47 = vunpack.c.h.bf16 %v1253_v15 }
  0x4b   : > { %v723_v52 = vpack.c.bf16 %v667_v32, %v665_v27  ;;  %v699_v54 = vmul.f32 %v635_v35, %v635_v35  ;;  %v662_v41 = vmul.f32 %v598_v18, %v598_v18  ;;  %v630_v42 = vunpack.c.h.bf16 %v1255_v21 }
  0x4c   : > { %779 = vmatpush.bf16.msrb.mxu2 %v724_v38  ;;  %792 = vmatpush.bf16.msrb.mxu3 %v740_v39  ;;  %v664_v53 = vmul.f32 %v600_v47, %v600_v47  ;;  %v632_v4 = vunpack.c.h.bf16 %v1257_v24  ;;  %v597_v7 = vunpack.c.l.bf16 %v1251_v14  ;;  %v599_v62 = vunpack.c.l.bf16 %v1253_v15 }
  0x4d   : > { %753 = vmatpush.bf16.msrb.mxu0 %v723_v52  ;;  %v739_v59 = vpack.c.bf16 %v699_v54, %v697_v40  ;;  %v694_v60 = vmul.f32 %v630_v42, %v630_v42  ;;  %v629_v43 = vunpack.c.l.bf16 %v1255_v21  ;;  %v631_v2 = vunpack.c.l.bf16 %v1257_v24 }
  0x4e   : > { %v722_v10 = vpack.c.bf16 %v664_v53, %v662_v41  ;;  %v696_v44 = vmul.f32 %v632_v4, %v632_v4  ;;  %v661_v13 = vmul.f32 %v597_v7, %v597_v7  ;;  %v663_v45 = vmul.f32 %v599_v62, %v599_v62 }
  0x4f   : > { %766 = vmatpush.bf16.msrb.mxu1 %v739_v59  ;;  %v693_v46 = vmul.f32 %v629_v43, %v629_v43  ;;  %v695_v48 = vmul.f32 %v631_v2, %v631_v2  ;;  %v594_v50 = vunpack.c.h.bf16 %v1275_v49  ;;  %v596_v14 = vunpack.c.h.bf16 %v1279_v57 }
  0x50   : > { %780 = vmatpush.bf16.msrb.mxu2 %v722_v10  ;;  %v738_v15 = vpack.c.bf16 %v696_v44, %v694_v60  ;;  %v721_v51 = vpack.c.bf16 %v663_v45, %v661_v13  ;;  %v626_v55 = vunpack.c.h.bf16 %v1281_v58  ;;  %v628_v21 = vunpack.c.h.bf16 %v1287_v5 }
  0x51   : > { %v737_v56 = vpack.c.bf16 %v695_v48, %v693_v46  ;;  %v658_v24 = vmul.f32 %v594_v50, %v594_v50  ;;  %v660_v61 = vmul.f32 %v596_v14, %v596_v14  ;;  %v593_v63 = vunpack.c.l.bf16 %v1275_v49 }
  0x52   : > { %793 = vmatpush.bf16.msrb.mxu3 %v738_v15  ;;  %754 = vmatpush.bf16.msrb.mxu0 %v721_v51  ;;  %v690_v0 = vmul.f32 %v626_v55, %v626_v55  ;;  %v692_v1 = vmul.f32 %v628_v21, %v628_v21  ;;  %v595_v3 = vunpack.c.l.bf16 %v1279_v57  ;;  %v625_v28 = vunpack.c.l.bf16 %v1281_v58 }
  0x53   : > { %767 = vmatpush.bf16.msrb.mxu1 %v737_v56  ;;  %v720_v6 = vpack.c.bf16 %v660_v61, %v658_v24  ;;  %v657_v8 = vmul.f32 %v593_v63, %v593_v63  ;;  %v627_v9 = vunpack.c.l.bf16 %v1287_v5  ;;  %v590_v17 = vunpack.c.h.bf16 %v1299_v30 }
  0x54   : > { %v736_v29 = vpack.c.bf16 %v692_v1, %v690_v0  ;;  %v659_v19 = vmul.f32 %v595_v3, %v595_v3  ;;  %v689_v22 = vmul.f32 %v625_v28, %v625_v28  ;;  %v592_v49 = vunpack.c.h.bf16 %v1301_v31 }
  0x55   : > { %781 = vmatpush.bf16.msrb.mxu2 %v720_v6  ;;  %v691_v23 = vmul.f32 %v627_v9, %v627_v9  ;;  %v654_v33 = vmul.f32 %v590_v17, %v590_v17  ;;  %v622_v11 = vunpack.c.h.bf16 %v1303_v36  ;;  %v624_v57 = vunpack.c.h.bf16 %v1305_v37 }
  0x56   : > { %794 = vmatpush.bf16.msrb.mxu3 %v736_v29  ;;  %v719_v58 = vpack.c.bf16 %v659_v19, %v657_v8  ;;  %v656_v12 = vmul.f32 %v592_v49, %v592_v49  ;;  %v589_v16 = vunpack.c.l.bf16 %v1299_v30  ;;  %v591_v5 = vunpack.c.l.bf16 %v1301_v31 }
  0x57   : > { %v735_v34 = vpack.c.bf16 %v691_v23, %v689_v22  ;;  %v686_v20 = vmul.f32 %v622_v11, %v622_v11  ;;  %v688_v25 = vmul.f32 %v624_v57, %v624_v57  ;;  %v621_v26 = vunpack.c.l.bf16 %v1303_v36 }
  0x58   : > { %755 = vmatpush.bf16.msrb.mxu0 %v719_v58  ;;  %v718_v27 = vpack.c.bf16 %v656_v12, %v654_v33  ;;  %v653_v32 = vmul.f32 %v589_v16, %v589_v16  ;;  %v655_v35 = vmul.f32 %v591_v5, %v591_v5  ;;  %v623_v18 = vunpack.c.l.bf16 %v1305_v37 }
  0x59   : > { %768 = vmatpush.bf16.msrb.mxu1 %v735_v34  ;;  %v734_v38 = vpack.c.bf16 %v688_v25, %v686_v20  ;;  %v685_v39 = vmul.f32 %v621_v26, %v621_v26  ;;  %v1075_v47 = vmov 1065369472   ;;  %v849_v37 = vlaneseq }
  0x5a   : > { %782 = vmatpush.bf16.msrb.mxu2 %v718_v27  ;;  %v717_v40 = vpack.c.bf16 %v655_v35, %v653_v32  ;;  %v687_v30 = vmul.f32 %v623_v18, %v623_v18 }
  0x5b   : > { %795 = vmatpush.bf16.msrb.mxu3 %v734_v38  ;;  %vm851_vm1 = vcmp.lt.s32.totalorder %v849_v37, 256 }
  0x5c   : > { %756 = vmatpush.bf16.msrb.mxu0 %v717_v40  ;;  %v733_v31 = vpack.c.bf16 %v687_v30, %v685_v39 }
  0x5d   : > { %783 = vmatmul.bf16.vlgmr.msrb.gmra.mxu2 %v1075_v47 }
  0x5e   : > { %769 = vmatpush.bf16.msrb.mxu1 %v733_v31  ;;  %796 = vmatmul.bf16.vlgmr.msrb.gmra.mxu3 %v1075_v47 }
  0x5f   : > { %757 = vmatmul.bf16.vlgmr.msrb.gmra.mxu0 %v1075_v47 }
  0x61   : > { %770 = vmatmul.bf16.vlgmr.msrb.gmra.mxu1 %v1075_v47 }
  0xb3   : > { %v522_v36 = vpop.f32.mrf.mxu0 }
  0xb4   : > { %v541_v52 = vpop.f32.mrf.mxu1 }
  0xb5   : > { %v542_v53 = vadd.f32 %v541_v52, %v522_v36 }
  0xb9   : > { %v560_v54 = vpop.f32.mrf.mxu2 }
  0xba   : > { %v579_v41 = vpop.f32.mrf.mxu3 }
  0xbb   : > { %v580_v42 = vadd.f32 %v579_v41, %v560_v54  ;;  %v524_v7 = vpop.f32.mrf.mxu0 }
  0xbc   : > { %v543_v59 = vpop.f32.mrf.mxu1 }
  0xbd   : > { %v845_v4 = vrot.slane %v580_v42, 7  ;;  %v544_v27 = vadd.f32 %v543_v59, %v524_v7 }
  0xbf   : > { %v847_v62 = vsel %vm846_vm0, %v542_v53, %v845_v4 }
  0xc0   : > { %853 = vst.msk [vmem:[%s230_s16] sm:$0x3] %vm851_vm1, %v847_v62 }
  0xc1   : > { %v562_v60 = vpop.f32.mrf.mxu2 }
  0xc2   : > { %v581_v43 = vpop.f32.mrf.mxu3 }
  0xc3   : > { %v527_v2 = vpop.f32.mrf.mxu0  ;;  %v582_v31 = vadd.f32 %v581_v43, %v562_v60 }
  0xc4   : > { %v546_v10 = vpop.f32.mrf.mxu1 }
  0xc5   : > { %v547_v32 = vadd.f32 %v546_v10, %v527_v2 }
  0xc9   : > { %v565_v44 = vpop.f32.mrf.mxu2 }
  0xcb   : > { %v584_v13 = vpop.f32.mrf.mxu3  ;;  %v529_v45 = vpop.f32.mrf.mxu0 }
  0xcc   : > { %v548_v46 = vpop.f32.mrf.mxu1  ;;  %v585_v47 = vadd.f32 %v584_v13, %v565_v44 }
  0xcd   : > { %v549_v35 = vadd.f32 %v548_v46, %v529_v45 }
  0xd1   : > { %v567_v48 = vpop.f32.mrf.mxu2 }
  0xd3   : > { %v586_v50 = vpop.f32.mrf.mxu3 }
  0xd4   : > { %v587_v36 = vadd.f32 %v586_v50, %v567_v48 }
  0xdc   : > { %v758_v14 = vpop.f32.mrf.mxu0 }
  0xde   : > { %v771_v15 = vpop.f32.mrf.mxu1 }
  0xdf   : > { %v772_v51 = vadd.f32 %v771_v15, %v758_v14 }
  0xe0   : > { %v784_v55 = vpop.f32.mrf.mxu2 }
  0xe1   : > { %1043 = vrsqrt.f32 %v772_v51  ;;  %v797_v21 = vpop.f32.mrf.mxu3  ;;  %vm808_vm2 = vcmp.eq.f32.partialorder %v772_v51, inf  ;;  %v811_v33 = vand.u32 2147483648, %v772_v51  ;;  %vm810_vm3 = vcmp.eq.f32.partialorder %v772_v51, 0.0 }
  0xe2   : > { %v798_v56 = vadd.f32 %v797_v21, %v784_v55 }
  0xe4   : > { %1045 = vrsqrt.f32 %v798_v56  ;;  %v760_v24 = vpop.f32.mrf.mxu0  ;;  %vm820_vm4 = vcmp.eq.f32.partialorder %v798_v56, inf  ;;  %v823_v5 = vand.u32 2147483648, %v798_v56  ;;  %vm822_vm5 = vcmp.eq.f32.partialorder %v798_v56, 0.0 }
  0xe6   : > { %v773_v61 = vpop.f32.mrf.mxu1 }
  0xe7   : > { %v1044_v63 = vpop.eup %1043 }
  0xe8   : > { %v802_v0 = vmul.f32 %v1044_v63, %v772_v51  ;;  %v786_v1 = vpop.f32.mrf.mxu2 }
  0xe9   : > { %v799_v3 = vpop.f32.mrf.mxu3 }
  0xea   : > { %v1046_v28 = vpop.eup %1045  ;;  %v803_v6 = vmul.f32 %v1044_v63, %v802_v0 }
  0xeb   : > { %v814_v8 = vmul.f32 %v1046_v28, %v798_v56 }
  0xec   : > { %v804_v9 = vmul.f32 0.5, %v803_v6 }
  0xed   : > { %v815_v17 = vmul.f32 %v1046_v28, %v814_v8 }
  0xee   : > { %v805_v29 = vsub.f32 1.5, %v804_v9 }
  0xef   : > { %v816_v19 = vmul.f32 0.5, %v815_v17 }
  0xf0   : > { %v806_v22 = vmul.f32 %v1044_v63, %v805_v29 }
  0xf1   : > { %v817_v49 = vsub.f32 1.5, %v816_v19 }
  0xf2   : > { %v807_v23 = vmul.f32 %v806_v22, %v772_v51 }
  0xf3   : > { %v818_v11 = vmul.f32 %v1046_v28, %v817_v49 }
  0xf4   : > { %v809_v57 = vsel %vm808_vm2, %v772_v51, %v807_v23 }
  0xf5   : > { %v812_v58 = vsel %vm810_vm3, %v811_v33, %v809_v57  ;;  %v819_v12 = vmul.f32 %v818_v11, %v798_v56 }
  0xf6   : > { %v825_v16 = vadd.f32 0.0001, %v812_v58 }
  0xf7   : > { %v821_v34 = vsel %vm820_vm4, %v798_v56, %v819_v12 }
  0xf8   : > { %1047 = vrcp.f32 %v825_v16  ;;  %v824_v20 = vsel %vm822_vm5, %v823_v5, %v821_v34 }
  0xf9   : > { %v826_v25 = vadd.f32 0.0001, %v824_v20 }
  0xfb   : > { %1049 = vrcp.f32 %v826_v25 }
  0xfe   : > { %v1048_v26 = vpop.eup %1047 }
  0xff   : > { %v829_v18 = vperm.slane %v1048_v26, 0 }
 0x101   : > { %v1050_v38 = vpop.eup %1049  ;;  %v831_v39 = vmul.f32 %v829_v18, %v544_v27  ;;  %v833_v40 = vmul.f32 %v829_v18, %v547_v32  ;;  %v835_v30 = vmul.f32 %v829_v18, %v549_v35 }
 0x102   : > { %v830_v52 = vperm.slane %v1050_v38, 0 }
 0x103   : > { %837 = vst [vmem:[%s221_s20] sm:$0xff] %v831_v39 }
 0x104   : > { %839 = vst [vmem:[%s221_s20 + $0x10] sm:$0xff] %v833_v40  ;;  %v832_v54 = vmul.f32 %v830_v52, %v582_v31  ;;  %v834_v37 = vmul.f32 %v830_v52, %v585_v47  ;;  %v836_v41 = vmul.f32 %v830_v52, %v587_v36 }
 0x105   : > { %841 = vst [vmem:[%s221_s20 + $0x20] sm:$0x7] %v835_v30 }
 0x106   : > { %838 = vst [vmem:[%s221_s20 + $0x8] sm:$0xff] %v832_v54 }
 0x107   : > { %840 = vst [vmem:[%s221_s20 + $0x18] sm:$0xff] %v834_v37 }
 0x108   : > { %842 = vst [vmem:[%s221_s20 + $0x28] sm:$0x7] %v836_v41 }
 0x109 PF: > { %s14_s14 = sadd.s32 1, %s1073_s14   ;;  %s1426_s12 = smov %s1069_s13 }
 0x10a   : > { %p11_p5 = scmp.ge.s32.totalorder %s14_s14, 4   ;;  %s1427_s13 = smov %s1429_s15 }
 0x10c   :  { %13 = sbr.rel (!%p11_p5) target bundleno = 2 (0x2), region = 70 }

</bundles_post_ra>
